<compile_context>
chip_gen: v5e
topology: v5e:2x2
jax: 0.10.0
libtpu: 0.0.40
codegen_flags: <defaults>
</compile_context>

<pallas_src>
import functools

import jax
import jax.numpy as jnp
from jax.experimental import pallas as pl
from jax.experimental.pallas import tpu as pltpu  # noqa: F401  (TPU backend)


def _round_up(x, m):
    return pl.cdiv(x, m) * m


def _fused_mlp_kernel(x_ref, w_ref, b_ref, o_ref, *, acts):
    """Fused MLP forward.

    x_ref: (Bp, F)      padded input activations
    w_ref: (L, F, F)    stacked, pre-transposed (in, out), zero-padded weights
    b_ref: (L, 1, F)    stacked, zero-padded biases
    acts:  static tuple of bools -- apply sigmoid after layer l?
    """
    h = x_ref[...]                                        # (Bp, F) f32
    for l, apply_sigmoid in enumerate(acts):              # static unrolled loop
        w = w_ref[l]                                      # (F, F) -- already (in, out)
        b = b_ref[l]                                      # (1, F)
        h = jnp.dot(h, w, preferred_element_type=jnp.float32) + b
        if apply_sigmoid:
            # exp lands on the EUP slot; divide is a tiny VALU op at this size.
            h = 1.0 / (1.0 + jnp.exp(-h))
    o_ref[...] = h.astype(o_ref.dtype)


def pack_params(params, feat_pad):
    """Pre-transpose each weight to (in, out), zero-pad to (feat_pad, feat_pad),
    and stack all layers so the fused kernel can index them by layer."""
    ws, bs, acts = [], [], []
    for w, b, act in params:
        wt = w.T  # (in_feat, out_feat) -- transpose once here, not in-kernel
        ws.append(jnp.pad(wt, ((0, feat_pad - wt.shape[0]),
                               (0, feat_pad - wt.shape[1]))))
        bs.append(jnp.pad(b[None, :], ((0, 0), (0, feat_pad - b.shape[0]))))
        acts.append(bool(act))
    return jnp.stack(ws), jnp.stack(bs), tuple(acts)


def fused_linear_model(x, w_stack, b_stack, acts, out_feat):
    """Run the whole MLP as a single Pallas kernel; returns (batch, out_feat)."""
    batch, in_feat = x.shape
    num_layers, feat_pad, _ = w_stack.shape
    batch_pad = _round_up(max(batch, 8), 8)
    x_pad = jnp.pad(x, ((0, batch_pad - batch), (0, feat_pad - in_feat)))

    kernel = functools.partial(_fused_mlp_kernel, acts=acts)
    out_pad = pl.pallas_call(
        kernel,
        out_shape=jax.ShapeDtypeStruct((batch_pad, feat_pad), jnp.float32),
        in_specs=[
            pl.BlockSpec((batch_pad, feat_pad), lambda: (0, 0)),
            pl.BlockSpec((num_layers, feat_pad, feat_pad), lambda: (0, 0, 0)),
            pl.BlockSpec((num_layers, 1, feat_pad), lambda: (0, 0, 0)),
        ],
        out_specs=pl.BlockSpec((batch_pad, feat_pad), lambda: (0, 0)),
    )(x_pad, w_stack, b_stack)
    # Slice away the lane/sublane padding.
    return out_pad[:batch, :out_feat]


def init_linear_params(key, in_feat, out_feat):
    """Deterministic init mimicking nn.Linear's uniform(-1/sqrt(in), 1/sqrt(in))."""
    kw, kb = jax.random.split(key)
    bound = 1.0 / jnp.sqrt(jnp.float32(in_feat))
    w = jax.random.uniform(kw, (out_feat, in_feat), jnp.float32, -bound, bound)
    b = jax.random.uniform(kb, (out_feat,), jnp.float32, -bound, bound)
    return w, b


def make_linear_model_params(key, in_feat, out_feat, hidden_feat, hidden_layer_count):
    """Layer list matching the PyTorch module:
       Linear(in,h) ; [Linear(h,h), Sigmoid] * N ; Linear(h,out) ; Sigmoid
    Returned as list of (w, b, apply_sigmoid) with PyTorch (out, in) weights."""
    params = []
    keys = jax.random.split(key, hidden_layer_count + 2)
    w, b = init_linear_params(keys[0], in_feat, hidden_feat)
    params.append((w, b, False))           # first Linear has NO sigmoid after it
    for i in range(hidden_layer_count):
        w, b = init_linear_params(keys[1 + i], hidden_feat, hidden_feat)
        params.append((w, b, True))
    w, b = init_linear_params(keys[-1], hidden_feat, out_feat)
    params.append((w, b, True))
    return params


def linear_model_reference(params, x):
    """Pure-JAX reference (matches the PyTorch forward)."""
    for w, b, act in params:
        x = x @ w.T + b
        if act:
            x = jax.nn.sigmoid(x)
    return x


if __name__ == "__main__":
    key = jax.random.PRNGKey(0)
    k_params, k_x = jax.random.split(key)

    batch, in_feat, hidden_feat, out_feat, hidden_layer_count = 8, 16, 32, 4, 2
    params = make_linear_model_params(
        k_params, in_feat, out_feat, hidden_feat, hidden_layer_count
    )
    x = jax.random.normal(k_x, (batch, in_feat), jnp.float32)

    # Pad every feature dim to a multiple of 128 lanes and stack the layers.
    feat_pad = _round_up(max(in_feat, hidden_feat, out_feat), 128)
    w_stack, b_stack, acts = pack_params(params, feat_pad)

    out = jax.block_until_ready(
        fused_linear_model(x, w_stack, b_stack, acts, out_feat)
    )
    ref = jax.block_until_ready(linear_model_reference(params, x))

    assert out.shape == (batch, out_feat)
    assert jnp.allclose(out, ref, atol=1e-5, rtol=1e-5)
    print("KERNEL_OK")
</pallas_src>

<mosaic_0001>
module attributes {stable_mosaic.version = 11 : i64} {
  func.func @_fused_mlp_kernel(%arg0: memref<8x128xf32, #tpu.memory_space<vmem>>, %arg1: memref<4x128x128xf32, #tpu.memory_space<vmem>>, %arg2: memref<4x1x128xf32, #tpu.memory_space<vmem>>, %arg3: memref<8x128xf32, #tpu.memory_space<vmem>>) attributes {dimension_semantics = [], scalar_prefetch = 0 : i64, scratch_operands = 0 : i64, tpu.core_type = #tpu.core_type<tc>} {
    %c0 = arith.constant 0 : index
    %c0_0 = arith.constant 0 : index
    %0 = vector.load %arg0[%c0, %c0_0] : memref<8x128xf32, #tpu.memory_space<vmem>>, vector<8x128xf32>
    %c0_1 = arith.constant 0 : index
    %c0_2 = arith.constant 0 : index
    %c0_3 = arith.constant 0 : index
    %1 = vector.load %arg1[%c0_1, %c0_2, %c0_3] : memref<4x128x128xf32, #tpu.memory_space<vmem>>, vector<1x128x128xf32>
    %2 = vector.shape_cast %1 : vector<1x128x128xf32> to vector<128x128xf32>
    %c0_4 = arith.constant 0 : index
    %c0_5 = arith.constant 0 : index
    %c0_6 = arith.constant 0 : index
    %3 = vector.load %arg2[%c0_4, %c0_5, %c0_6] : memref<4x1x128xf32, #tpu.memory_space<vmem>>, vector<1x1x128xf32>
    %4 = vector.shape_cast %3 : vector<1x1x128xf32> to vector<1x128xf32>
    %cst = arith.constant dense<0.000000e+00> : vector<8x128xf32>
    %5 = tpu.matmul %0, %2, %cst {dimension_numbers = #tpu.dot_dimension_numbers<[1], [0], [0], [1], [0, 0, 1, 1], [], []>} : vector<8x128xf32>, vector<128x128xf32>, vector<8x128xf32> -> vector<8x128xf32>
    %6 = vector.broadcast %4 : vector<1x128xf32> to vector<8x128xf32>
    %7 = arith.addf %5, %6 : vector<8x128xf32>
    %c1 = arith.constant 1 : index
    %c0_7 = arith.constant 0 : index
    %c0_8 = arith.constant 0 : index
    %8 = vector.load %arg1[%c1, %c0_7, %c0_8] : memref<4x128x128xf32, #tpu.memory_space<vmem>>, vector<1x128x128xf32>
    %9 = vector.shape_cast %8 : vector<1x128x128xf32> to vector<128x128xf32>
    %c1_9 = arith.constant 1 : index
    %c0_10 = arith.constant 0 : index
    %c0_11 = arith.constant 0 : index
    %10 = vector.load %arg2[%c1_9, %c0_10, %c0_11] : memref<4x1x128xf32, #tpu.memory_space<vmem>>, vector<1x1x128xf32>
    %11 = vector.shape_cast %10 : vector<1x1x128xf32> to vector<1x128xf32>
    %cst_12 = arith.constant dense<0.000000e+00> : vector<8x128xf32>
    %12 = tpu.matmul %7, %9, %cst_12 {dimension_numbers = #tpu.dot_dimension_numbers<[1], [0], [0], [1], [0, 0, 1, 1], [], []>} : vector<8x128xf32>, vector<128x128xf32>, vector<8x128xf32> -> vector<8x128xf32>
    %13 = vector.broadcast %11 : vector<1x128xf32> to vector<8x128xf32>
    %14 = arith.addf %12, %13 : vector<8x128xf32>
    %cst_13 = arith.constant 0.000000e+00 : f32
    %15 = vector.broadcast %cst_13 : f32 to vector<8x128xf32>
    %16 = arith.subf %15, %14 : vector<8x128xf32>
    %17 = math.exp %16 : vector<8x128xf32>
    %cst_14 = arith.constant 1.000000e+00 : f32
    %18 = vector.broadcast %cst_14 : f32 to vector<8x128xf32>
    %19 = arith.addf %18, %17 : vector<8x128xf32>
    %cst_15 = arith.constant 1.000000e+00 : f32
    %20 = vector.broadcast %cst_15 : f32 to vector<8x128xf32>
    %21 = arith.divf %20, %19 : vector<8x128xf32>
    %c2 = arith.constant 2 : index
    %c0_16 = arith.constant 0 : index
    %c0_17 = arith.constant 0 : index
    %22 = vector.load %arg1[%c2, %c0_16, %c0_17] : memref<4x128x128xf32, #tpu.memory_space<vmem>>, vector<1x128x128xf32>
    %23 = vector.shape_cast %22 : vector<1x128x128xf32> to vector<128x128xf32>
    %c2_18 = arith.constant 2 : index
    %c0_19 = arith.constant 0 : index
    %c0_20 = arith.constant 0 : index
    %24 = vector.load %arg2[%c2_18, %c0_19, %c0_20] : memref<4x1x128xf32, #tpu.memory_space<vmem>>, vector<1x1x128xf32>
    %25 = vector.shape_cast %24 : vector<1x1x128xf32> to vector<1x128xf32>
    %cst_21 = arith.constant dense<0.000000e+00> : vector<8x128xf32>
    %26 = tpu.matmul %21, %23, %cst_21 {dimension_numbers = #tpu.dot_dimension_numbers<[1], [0], [0], [1], [0, 0, 1, 1], [], []>} : vector<8x128xf32>, vector<128x128xf32>, vector<8x128xf32> -> vector<8x128xf32>
    %27 = vector.broadcast %25 : vector<1x128xf32> to vector<8x128xf32>
    %28 = arith.addf %26, %27 : vector<8x128xf32>
    %cst_22 = arith.constant 0.000000e+00 : f32
    %29 = vector.broadcast %cst_22 : f32 to vector<8x128xf32>
    %30 = arith.subf %29, %28 : vector<8x128xf32>
    %31 = math.exp %30 : vector<8x128xf32>
    %cst_23 = arith.constant 1.000000e+00 : f32
    %32 = vector.broadcast %cst_23 : f32 to vector<8x128xf32>
    %33 = arith.addf %32, %31 : vector<8x128xf32>
    %cst_24 = arith.constant 1.000000e+00 : f32
    %34 = vector.broadcast %cst_24 : f32 to vector<8x128xf32>
    %35 = arith.divf %34, %33 : vector<8x128xf32>
    %c3 = arith.constant 3 : index
    %c0_25 = arith.constant 0 : index
    %c0_26 = arith.constant 0 : index
    %36 = vector.load %arg1[%c3, %c0_25, %c0_26] : memref<4x128x128xf32, #tpu.memory_space<vmem>>, vector<1x128x128xf32>
    %37 = vector.shape_cast %36 : vector<1x128x128xf32> to vector<128x128xf32>
    %c3_27 = arith.constant 3 : index
    %c0_28 = arith.constant 0 : index
    %c0_29 = arith.constant 0 : index
    %38 = vector.load %arg2[%c3_27, %c0_28, %c0_29] : memref<4x1x128xf32, #tpu.memory_space<vmem>>, vector<1x1x128xf32>
    %39 = vector.shape_cast %38 : vector<1x1x128xf32> to vector<1x128xf32>
    %cst_30 = arith.constant dense<0.000000e+00> : vector<8x128xf32>
    %40 = tpu.matmul %35, %37, %cst_30 {dimension_numbers = #tpu.dot_dimension_numbers<[1], [0], [0], [1], [0, 0, 1, 1], [], []>} : vector<8x128xf32>, vector<128x128xf32>, vector<8x128xf32> -> vector<8x128xf32>
    %41 = vector.broadcast %39 : vector<1x128xf32> to vector<8x128xf32>
    %42 = arith.addf %40, %41 : vector<8x128xf32>
    %cst_31 = arith.constant 0.000000e+00 : f32
    %43 = vector.broadcast %cst_31 : f32 to vector<8x128xf32>
    %44 = arith.subf %43, %42 : vector<8x128xf32>
    %45 = math.exp %44 : vector<8x128xf32>
    %cst_32 = arith.constant 1.000000e+00 : f32
    %46 = vector.broadcast %cst_32 : f32 to vector<8x128xf32>
    %47 = arith.addf %46, %45 : vector<8x128xf32>
    %cst_33 = arith.constant 1.000000e+00 : f32
    %48 = vector.broadcast %cst_33 : f32 to vector<8x128xf32>
    %49 = arith.divf %48, %47 : vector<8x128xf32>
    %c0_34 = arith.constant 0 : index
    %c0_35 = arith.constant 0 : index
    %50 = vector.load %arg3[%c0_34, %c0_35] : memref<8x128xf32, #tpu.memory_space<vmem>>, vector<8x128xf32>
    tpu.vector_store %arg3[%c0_34, %c0_35], %49 {strides = array<i32>} : memref<8x128xf32, #tpu.memory_space<vmem>>, vector<8x128xf32>,
    return
  }
}

</mosaic_0001>

<bundles_post_ra>
// kernel: tpu_custom_call.1
= control target key start
LH: loop header
LB: loop body
LE: loop exit
PB: predicated region body
PF: predicated region fallthrough
CT: control target
= control target key end

     0   :  { %8 = vsyncpa [#allocation3], 0  ;;  %s469_s0 = inlined_call_operand.hbm [shape: f32[8,128], index: 0, kind: input, shape index: {}]   ;;  %s470_s1 = inlined_call_operand.hbm [shape: f32[4,128,128], index: 1, kind: input, shape index: {}]   ;;  %s471_s2 = inlined_call_operand.hbm [shape: f32[4,1,128], index: 2, kind: input, shape index: {}]   ;;  %s472_s3 = inlined_call_operand.hbm [shape: f32[8,128], index: 3, kind: output, shape index: {}]  }
   0x1   :  { %9 = vsyncpa [#allocation6], 0  ;;  %s26_s14 = sshll.u32 %s470_s1, 4  ;;  %s27_s14 = int_to_ptr.hbm [resolvable:$true] %s26_s14 }
   0x2   :  { %10 = vsyncpa [#allocation4], 0  ;;  %s429_s15 = smov [#allocation5]   ;;  %s16_s19 = sshll.u32 %s469_s0, 4  ;;  %s17_s19 = int_to_ptr.hbm [resolvable:$true] %s16_s19 }
   0x3   :  { %s28_s16 = sshll.u32 %s429_s15, 4  ;;  %s430_s20 = smov 128   ;;  %s29_s16 = int_to_ptr.vmem [resolvable:$true] %s28_s16 }
   0x4   :  { %s431_s21 = smov 8   ;;  %s432_s22 = smov [#allocation2]  }
   0x5   :  { %34 = dma.hbm_to_vmem [thread:$0]  %s27_s14, 8192, %s29_s16, [#allocation6], %s430_s20, %s430_s20, %s431_s21  }
   0x6   :  { %s18_s23 = sshll.u32 %s432_s22, 4  ;;  %s39_s26 = sshll.u32 %s471_s2, 4  ;;  %s19_s23 = int_to_ptr.vmem [resolvable:$true] %s18_s23  ;;  %s40_s26 = int_to_ptr.hbm [resolvable:$true] %s39_s26 }
   0x7   :  { %21 = dma.hbm_to_vmem [thread:$0]  %s17_s19, 128, %s19_s23, [#allocation3]  }
   0x8   :  { %s433_s1 = smov [#allocation7]   ;;  %s434_s28 = smov 16  }
   0x9   :  { %s41_s27 = sshll.u32 %s433_s1, 4  ;;  %s435_s29 = smov 1   ;;  %s42_s27 = int_to_ptr.vmem [resolvable:$true] %s41_s27 }
   0xa   :  { %47 = dma.hbm_to_vmem [thread:$0]  %s40_s26, 64, %s42_s27, [#allocation6], %s434_s28, %s434_s28, %s435_s29  }
   0xb   :  { %423 = dma.done.wait [#allocation3], 128  }
   0xc   :  { %424 = vsyncadd [#allocation3], 4294967168 }
   0xd   :  { %425 = dma.done.wait [#allocation6], 8256  }
   0xe   :  { %426 = vsyncadd [#allocation6], 4294959040  ;;  %v76_v0 = vld [vmem:[#allocation5 + $0x78] sm:$0xff]  ;;  %v75_v1 = vld [vmem:[#allocation5 + $0x70] sm:$0xff]  ;;  %s436_s0 = smov [#allocation8]   ;;  %s292_s5 = sshll.u32 %s472_s3, 4  ;;  %s293_s5 = int_to_ptr.hbm [resolvable:$true] %s292_s5 }
   0xf   :  { %81 = vmatpush.msra.mxu0 %v76_v0  ;;  %v74_v2 = vld [vmem:[#allocation5 + $0x68] sm:$0xff]  ;;  %v73_v3 = vld [vmem:[#allocation5 + $0x60] sm:$0xff]  ;;  %v117_v4 = vld [vmem:[#allocation5 + $0xf8] sm:$0xff]  ;;  %s290_s2 = sshll.u32 %s436_s0, 4  ;;  %s291_s2 = int_to_ptr.vmem [resolvable:$true] %s290_s2 }
  0x10   :  { %v72_v5 = vld [vmem:[#allocation5 + $0x58] sm:$0xff]  ;;  %123 = vmatpush.msra.mxu1 %v117_v4  ;;  %v116_v6 = vld [vmem:[#allocation5 + $0xf0] sm:$0xff]  ;;  %v115_v7 = vld [vmem:[#allocation5 + $0xe8] sm:$0xff] }
  0x11   :  { %82 = vmatpush.msra.mxu0 %v75_v1  ;;  %v71_v8 = vld [vmem:[#allocation5 + $0x50] sm:$0xff]  ;;  %v114_v9 = vld [vmem:[#allocation5 + $0xe0] sm:$0xff]  ;;  %v70_v10 = vld [vmem:[#allocation5 + $0x48] sm:$0xff] }
  0x12   :  { %124 = vmatpush.msra.mxu1 %v116_v6  ;;  %v113_v11 = vld [vmem:[#allocation5 + $0xd8] sm:$0xff]  ;;  %v69_v12 = vld [vmem:[#allocation5 + $0x40] sm:$0xff]  ;;  %v112_v13 = vld [vmem:[#allocation5 + $0xd0] sm:$0xff] }
  0x13   :  { %83 = vmatpush.msra.mxu0 %v74_v2  ;;  %v68_v14 = vld [vmem:[#allocation5 + $0x38] sm:$0xff]  ;;  %v111_v15 = vld [vmem:[#allocation5 + $0xc8] sm:$0xff]  ;;  %v67_v16 = vld [vmem:[#allocation5 + $0x30] sm:$0xff] }
  0x14   :  { %125 = vmatpush.msra.mxu1 %v115_v7  ;;  %v110_v17 = vld [vmem:[#allocation5 + $0xc0] sm:$0xff]  ;;  %v66_v18 = vld [vmem:[#allocation5 + $0x28] sm:$0xff]  ;;  %v109_v19 = vld [vmem:[#allocation5 + $0xb8] sm:$0xff] }
  0x15   :  { %84 = vmatpush.msra.mxu0 %v73_v3  ;;  %v65_v20 = vld [vmem:[#allocation5 + $0x20] sm:$0xff]  ;;  %v108_v21 = vld [vmem:[#allocation5 + $0xb0] sm:$0xff]  ;;  %v64_v22 = vld [vmem:[#allocation5 + $0x18] sm:$0xff] }
  0x16   :  { %126 = vmatpush.msra.mxu1 %v114_v9  ;;  %v107_v23 = vld [vmem:[#allocation5 + $0xa8] sm:$0xff]  ;;  %v63_v24 = vld [vmem:[#allocation5 + $0x10] sm:$0xff]  ;;  %v106_v25 = vld [vmem:[#allocation5 + $0xa0] sm:$0xff] }
  0x17   :  { %85 = vmatpush.msra.mxu0 %v72_v5  ;;  %v62_v26 = vld [vmem:[#allocation5 + $0x8] sm:$0xff]  ;;  %v105_v27 = vld [vmem:[#allocation5 + $0x98] sm:$0xff]  ;;  %v61_v28 = vld [vmem:[#allocation5] sm:$0xff] }
  0x18   :  { %127 = vmatpush.msra.mxu1 %v113_v11  ;;  %v60_v29 = vld [vmem:[#allocation2] sm:$0xff]  ;;  %v104_v30 = vld [vmem:[#allocation5 + $0x90] sm:$0xff]  ;;  %v103_v31 = vld [vmem:[#allocation5 + $0x88] sm:$0xff] }
  0x19   :  { %86 = vmatpush.msra.mxu0 %v71_v8  ;;  %v102_v32 = vld [vmem:[#allocation5 + $0x80] sm:$0xff]  ;;  %v178_v36 = vld [vmem:[#allocation5 + $0x178] sm:$0xff]  ;;  %v177_v37 = vld [vmem:[#allocation5 + $0x170] sm:$0xff] }
  0x1a   :  { %128 = vmatpush.msra.mxu1 %v112_v13  ;;  %v311_v33 = vld [vmem:[#allocation7] ss:$0 sm:$0xff]  ;;  %184 = vmatpush.msra.mxu2 %v178_v36  ;;  %v176_v38 = vld [vmem:[#allocation5 + $0x168] sm:$0xff]  ;;  %v174_v40 = vld [vmem:[#allocation5 + $0x158] sm:$0xff] }
  0x1b   :  { %87 = vmatpush.msra.mxu0 %v70_v10  ;;  %v175_v39 = vld [vmem:[#allocation5 + $0x160] sm:$0xff]  ;;  %v173_v41 = vld [vmem:[#allocation5 + $0x150] sm:$0xff]  ;;  %v172_v42 = vld [vmem:[#allocation5 + $0x148] sm:$0xff] }
  0x1c   :  { %129 = vmatpush.msra.mxu1 %v111_v15  ;;  %185 = vmatpush.msra.mxu2 %v177_v37  ;;  %v171_v43 = vld [vmem:[#allocation5 + $0x140] sm:$0xff]  ;;  %v170_v44 = vld [vmem:[#allocation5 + $0x138] sm:$0xff]  ;;  %v169_v45 = vld [vmem:[#allocation5 + $0x130] sm:$0xff] }
  0x1d   :  { %88 = vmatpush.msra.mxu0 %v69_v12  ;;  %v168_v46 = vld [vmem:[#allocation5 + $0x128] sm:$0xff]  ;;  %v167_v47 = vld [vmem:[#allocation5 + $0x120] sm:$0xff]  ;;  %v166_v48 = vld [vmem:[#allocation5 + $0x118] sm:$0xff] }
  0x1e   :  { %130 = vmatpush.msra.mxu1 %v110_v17  ;;  %186 = vmatpush.msra.mxu2 %v176_v38  ;;  %v165_v49 = vld [vmem:[#allocation5 + $0x110] sm:$0xff]  ;;  %v164_v50 = vld [vmem:[#allocation5 + $0x108] sm:$0xff]  ;;  %v312_v51 = vld [vmem:[#allocation7 + $0x1] ss:$0 sm:$0xff] }
  0x1f   :  { %89 = vmatpush.msra.mxu0 %v68_v14  ;;  %v163_v52 = vld [vmem:[#allocation5 + $0x100] sm:$0xff]  ;;  %v239_v5 = vld [vmem:[#allocation5 + $0x1f8] sm:$0xff]  ;;  %v238_v6 = vld [vmem:[#allocation5 + $0x1f0] sm:$0xff] }
  0x20   :  { %131 = vmatpush.msra.mxu1 %v109_v19  ;;  %187 = vmatpush.msra.mxu2 %v175_v39  ;;  %v237_v7 = vld [vmem:[#allocation5 + $0x1e8] sm:$0xff]  ;;  %v236_v8 = vld [vmem:[#allocation5 + $0x1e0] sm:$0xff]  ;;  %v235_v9 = vld [vmem:[#allocation5 + $0x1d8] sm:$0xff] }
  0x21   :  { %90 = vmatpush.msra.mxu0 %v67_v16  ;;  %245 = vmatpush.msra.mxu3 %v239_v5  ;;  %v234_v10 = vld [vmem:[#allocation5 + $0x1d0] sm:$0xff]  ;;  %v233_v11 = vld [vmem:[#allocation5 + $0x1c8] sm:$0xff]  ;;  %v232_v12 = vld [vmem:[#allocation5 + $0x1c0] sm:$0xff] }
  0x22   :  { %132 = vmatpush.msra.mxu1 %v108_v21  ;;  %188 = vmatpush.msra.mxu2 %v174_v40  ;;  %v231_v13 = vld [vmem:[#allocation5 + $0x1b8] sm:$0xff]  ;;  %v230_v14 = vld [vmem:[#allocation5 + $0x1b0] sm:$0xff]  ;;  %v229_v15 = vld [vmem:[#allocation5 + $0x1a8] sm:$0xff] }
  0x23   :  { %91 = vmatpush.msra.mxu0 %v66_v18  ;;  %246 = vmatpush.msra.mxu3 %v238_v6  ;;  %v228_v16 = vld [vmem:[#allocation5 + $0x1a0] sm:$0xff]  ;;  %v227_v17 = vld [vmem:[#allocation5 + $0x198] sm:$0xff]  ;;  %v226_v18 = vld [vmem:[#allocation5 + $0x190] sm:$0xff] }
  0x24   :  { %133 = vmatpush.msra.mxu1 %v107_v23  ;;  %189 = vmatpush.msra.mxu2 %v173_v41  ;;  %v225_v19 = vld [vmem:[#allocation5 + $0x188] sm:$0xff]  ;;  %v224_v21 = vld [vmem:[#allocation5 + $0x180] sm:$0xff] }
  0x25   :  { %92 = vmatpush.msra.mxu0 %v65_v20  ;;  %247 = vmatpush.msra.mxu3 %v237_v7  ;;  %v313_v20 = vld [vmem:[#allocation7 + $0x2] ss:$0 sm:$0xff]  ;;  %v314_v38 = vld [vmem:[#allocation7 + $0x3] ss:$0 sm:$0xff] }
  0x26   :  { %134 = vmatpush.msra.mxu1 %v106_v25  ;;  %190 = vmatpush.msra.mxu2 %v172_v42 }
  0x27   :  { %93 = vmatpush.msra.mxu0 %v64_v22  ;;  %248 = vmatpush.msra.mxu3 %v236_v8 }
  0x28   :  { %135 = vmatpush.msra.mxu1 %v105_v27  ;;  %191 = vmatpush.msra.mxu2 %v171_v43 }
  0x29   :  { %94 = vmatpush.msra.mxu0 %v63_v24  ;;  %249 = vmatpush.msra.mxu3 %v235_v9 }
  0x2a   :  { %136 = vmatpush.msra.mxu1 %v104_v30  ;;  %192 = vmatpush.msra.mxu2 %v170_v44 }
  0x2b   :  { %95 = vmatpush.msra.mxu0 %v62_v26  ;;  %250 = vmatpush.msra.mxu3 %v234_v10 }
  0x2c   :  { %137 = vmatpush.msra.mxu1 %v103_v31  ;;  %193 = vmatpush.msra.mxu2 %v169_v45 }
  0x2d   :  { %96 = vmatpush.msra.mxu0 %v61_v28  ;;  %251 = vmatpush.msra.mxu3 %v233_v11 }
  0x2e   :  { %97 = vmatmul.f32.vlgmr.msra.gmra.mxu0 %v60_v29  ;;  %138 = vmatpush.msra.mxu1 %v102_v32 }
  0x2f   :  { %194 = vmatpush.msra.mxu2 %v168_v46  ;;  %252 = vmatpush.msra.mxu3 %v232_v12 }
  0x31   :  { %195 = vmatpush.msra.mxu2 %v167_v47  ;;  %253 = vmatpush.msra.mxu3 %v231_v13 }
  0x33   :  { %196 = vmatpush.msra.mxu2 %v166_v48  ;;  %254 = vmatpush.msra.mxu3 %v230_v14 }
  0x35   :  { %197 = vmatpush.msra.mxu2 %v165_v49  ;;  %255 = vmatpush.msra.mxu3 %v229_v15 }
  0x37   :  { %198 = vmatpush.msra.mxu2 %v164_v50  ;;  %256 = vmatpush.msra.mxu3 %v228_v16 }
  0x39   :  { %199 = vmatpush.msra.mxu2 %v163_v52  ;;  %257 = vmatpush.msra.mxu3 %v227_v17 }
  0x3b   :  { %258 = vmatpush.msra.mxu3 %v226_v18 }
  0x3d   :  { %259 = vmatpush.msra.mxu3 %v225_v19 }
  0x3f   :  { %260 = vmatpush.msra.mxu3 %v224_v21 }
  0xab   :  { %v98_v34 = vpop.f32.mrf.mxu0 }
  0xac   :  { %v99_v35 = vadd.f32 %v311_v33, %v98_v34 }
  0xae   :  { %139 = vmatmul.f32.vlgmr.msra.gmra.mxu1 %v99_v35 }
 0x12b   :  { %v140_v53 = vpop.f32.mrf.mxu1 }
 0x12c   :  { %v141_v54 = vadd.f32 %v312_v51, %v140_v53 }
 0x12e   :  { %v143_v55 = vsub.f32 0.0, %v141_v54 }
 0x130   :  { %v144_v56 = vmul.f32 1.442695, %v143_v55 }
 0x132   :  { %315 = vpow2.f32 %v144_v56 }
 0x138   :  { %v316_v57 = vpop.eup %315 }
 0x139   :  { %v146_v58 = vadd.f32 1.0, %v316_v57 }
 0x13b   :  { %317 = vrcp.f32 %v146_v58  ;;  %v158_v62 = vand.u32 2147483648, %v146_v58  ;;  %v156_v0 = vand.u32 2147483647, %v146_v58  ;;  %vm152_vm1 = vweird.f32 %v146_v58 }
 0x13d   :  { %v159_v2 = vor.u32 1.1754944e-38, %v158_v62  ;;  %vm157_vm3 = vcmp.eq.f32.partialorder %v156_v0, 8.507059e+37 }
 0x141   :  { %v318_v59 = vpop.eup %317 }
 0x142   :  { %v148_v60 = vmul.f32 %v318_v59, %v146_v58  ;;  %vm153_vm0 = vweird.f32 %v318_v59 }
 0x143   :  { %vm154_vm2 = vmor %vm152_vm1, %vm153_vm0 }
 0x144   :  { %v149_v61 = vsub.f32 1.0, %v148_v60 }
 0x146   :  { %v150_v63 = vmul.f32 %v318_v59, %v149_v61 }
 0x148   :  { %v151_v1 = vadd.f32 %v318_v59, %v150_v63 }
 0x14a   :  { %v155_v3 = vsel %vm154_vm2, %v318_v59, %v151_v1 }
 0x14b   :  { %v160_v4 = vsel %vm157_vm3, %v159_v2, %v155_v3 }
 0x14c   :  { %200 = vmatmul.f32.vlgmr.msra.gmra.mxu2 %v160_v4 }
 0x1cf   :  { %v201_v22 = vpop.f32.mrf.mxu2 }
 0x1d0   :  { %v202_v23 = vadd.f32 %v313_v20, %v201_v22 }
 0x1d2   :  { %v204_v24 = vsub.f32 0.0, %v202_v23 }
 0x1d4   :  { %v205_v25 = vmul.f32 1.442695, %v204_v24 }
 0x1d6   :  { %319 = vpow2.f32 %v205_v25 }
 0x1dc   :  { %v320_v26 = vpop.eup %319 }
 0x1dd   :  { %v207_v27 = vadd.f32 1.0, %v320_v26 }
 0x1df   :  { %321 = vrcp.f32 %v207_v27  ;;  %v219_v31 = vand.u32 2147483648, %v207_v27  ;;  %v217_v33 = vand.u32 2147483647, %v207_v27  ;;  %vm213_vm5 = vweird.f32 %v207_v27 }
 0x1e1   :  { %v220_v35 = vor.u32 1.1754944e-38, %v219_v31  ;;  %vm218_vm7 = vcmp.eq.f32.partialorder %v217_v33, 8.507059e+37 }
 0x1e5   :  { %v322_v28 = vpop.eup %321 }
 0x1e6   :  { %v209_v29 = vmul.f32 %v322_v28, %v207_v27  ;;  %vm214_vm4 = vweird.f32 %v322_v28 }
 0x1e7   :  { %vm215_vm6 = vmor %vm213_vm5, %vm214_vm4 }
 0x1e8   :  { %v210_v30 = vsub.f32 1.0, %v209_v29 }
 0x1ea   :  { %v211_v32 = vmul.f32 %v322_v28, %v210_v30 }
 0x1ec   :  { %v212_v34 = vadd.f32 %v322_v28, %v211_v32 }
 0x1ee   :  { %v216_v36 = vsel %vm215_vm6, %v322_v28, %v212_v34 }
 0x1ef   :  { %v221_v37 = vsel %vm218_vm7, %v220_v35, %v216_v36 }
 0x1f0   :  { %261 = vmatmul.f32.vlgmr.msra.gmra.mxu3 %v221_v37 }
 0x273   :  { %v262_v39 = vpop.f32.mrf.mxu3 }
 0x274   :  { %v263_v40 = vadd.f32 %v314_v38, %v262_v39 }
 0x276   :  { %v265_v41 = vsub.f32 0.0, %v263_v40 }
 0x278   :  { %v266_v42 = vmul.f32 1.442695, %v265_v41 }
 0x27a   :  { %323 = vpow2.f32 %v266_v42 }
 0x280   :  { %v324_v43 = vpop.eup %323 }
 0x281   :  { %v268_v44 = vadd.f32 1.0, %v324_v43 }
 0x283   :  { %325 = vrcp.f32 %v268_v44  ;;  %v280_v48 = vand.u32 2147483648, %v268_v44  ;;  %v278_v50 = vand.u32 2147483647, %v268_v44  ;;  %vm274_vm9 = vweird.f32 %v268_v44 }
 0x285   :  { %v281_v52 = vor.u32 1.1754944e-38, %v280_v48  ;;  %vm279_vm11 = vcmp.eq.f32.partialorder %v278_v50, 8.507059e+37 }
 0x289   :  { %v326_v45 = vpop.eup %325 }
 0x28a   :  { %v270_v46 = vmul.f32 %v326_v45, %v268_v44  ;;  %vm275_vm8 = vweird.f32 %v326_v45 }
 0x28b   :  { %vm276_vm10 = vmor %vm274_vm9, %vm275_vm8 }
 0x28c   :  { %v271_v47 = vsub.f32 1.0, %v270_v46 }
 0x28e   :  { %v272_v49 = vmul.f32 %v326_v45, %v271_v47 }
 0x290   :  { %v273_v51 = vadd.f32 %v326_v45, %v272_v49 }
 0x292   :  { %v277_v53 = vsel %vm276_vm10, %v326_v45, %v273_v51 }
 0x293   :  { %v282_v54 = vsel %vm279_vm11, %v281_v52, %v277_v53 }
 0x294   :  { %284 = vst [vmem:[#allocation8] sm:$0xff] %v282_v54 }
 0x295   :  { %295 = dma.vmem_to_hbm [thread:$0]  %s291_s2, 128, %s293_s5, [#allocation4]  }
 0x296   :  { %427 = dma.done.wait [#allocation4], 128  }
 0x297   :  { %428 = vsyncadd [#allocation4], 4294967168 }
 0x298   :  { %300 = vsyncpa [#allocation3], 1 }
 0x299   :  { %301 = vsyncpa [#allocation6], 1 }
 0x29a   :  { %302 = vsyncpa [#allocation4], 1 }

</bundles_post_ra>
